<compile_context>
chip_gen: v6e
topology: v6e:2x2x1
jax: 0.10.0
libtpu: 0.0.40
codegen_flags: <defaults>
</compile_context>

<pallas_src>
import math
import numpy as np

import jax
import jax.numpy as jnp
from jax.experimental import pallas as pl
from jax.experimental.pallas import tpu as pltpu


# -----------------------------------------------------------------------------
# Parameter / filter construction (plain numpy, deterministic, no scipy).
# -----------------------------------------------------------------------------
def _discrete_gaussian_kernel(scale, width, n_terms=160):
    """Normalized discrete Gaussian kernel exp(-t) I_|x|(t) / sum(...).

    I_n(t) is computed with its power series in log-space.  The exp(-t) factor
    of scipy.special.ive cancels under normalization, so this matches the
    PyTorch module's kernel.
    """
    xs = np.arange(-width, width + 1)
    orders = np.abs(xs)
    t = float(scale)
    vals = np.zeros(xs.shape[0], dtype=np.float64)
    log_half_t = math.log(t / 2.0)
    for idx, n in enumerate(orders):
        s = 0.0
        for m in range(n_terms):
            log_term = ((2 * m + n) * log_half_t
                        - math.lgamma(m + 1)
                        - math.lgamma(m + n + 1))
            s += math.exp(log_term)
        vals[idx] = s
    vals = vals / vals.sum()
    return vals.astype(np.float32)


def _band_matrix(kernel_1d, n):
    """Dense banded (symmetric) matrix A so that X @ A == 'same'-padded 1-D
    conv along the last axis; A @ X implements it along the first axis."""
    k = np.asarray(kernel_1d, dtype=np.float32)
    w = (k.shape[0] - 1) // 2
    A = np.zeros((n, n), dtype=np.float32)
    for i in range(n):
        lo = max(0, i - w)
        hi = min(n, i + w + 1)
        A[i, lo:hi] = k[lo - i + w: hi - i + w]
    return A


def make_bessel_params(base, zero_scale, n_scales, H, W):
    """Returns (scales, widths, kernels_1d, Ah, Aw) for the BLUR scales only.

    Ah: (Sb, H, H), Aw: (Sb, W, W), Sb = n_scales - 1 (identity scale is
    handled exactly in the wrapper, not in the kernel).
    """
    k = np.arange(1, n_scales)
    dilations = np.power(base, k)
    scales = zero_scale ** 2 * (dilations ** 2 - 1.0)
    widths = np.asarray([4 * int(np.ceil(np.sqrt(s))) for s in scales])

    kernels_1d, ah_list, aw_list = [], [], []
    for s, w in zip(scales, widths):
        k1d = _discrete_gaussian_kernel(s, int(w))
        kernels_1d.append(k1d)
        ah_list.append(_band_matrix(k1d, H))
        aw_list.append(_band_matrix(k1d, W))

    if ah_list:
        Ah = jnp.asarray(np.stack(ah_list, axis=0))
        Aw = jnp.asarray(np.stack(aw_list, axis=0))
    else:
        Ah = jnp.zeros((0, H, H), jnp.float32)
        Aw = jnp.zeros((0, W, W), jnp.float32)
    return scales, widths, kernels_1d, Ah, Aw


# -----------------------------------------------------------------------------
# Pallas kernel: one (scale, batch-tile) per grid point; the batch tile is
# folded along the lane axis so both matmuls are lane-dense.
# -----------------------------------------------------------------------------
def bessel_blur_kernel(x_ref, ah_ref, awb_ref, o_ref):
    # x_ref:   (H, TB*W)     TB images stacked along lanes (columns)
    # ah_ref:  (H, H)        vertical-blur band matrix for this scale
    # awb_ref: (TB*W, TB*W)  block-diagonal horizontal-blur matrix
    tmp = jnp.dot(ah_ref[...], x_ref[...], preferred_element_type=jnp.float32)
    out = jnp.dot(tmp, awb_ref[...], preferred_element_type=jnp.float32)
    o_ref[...] = out.astype(o_ref.dtype)


def _pick_batch_tile(n_imgs, W, max_lanes=1024):
    """Largest divisor of n_imgs with TB*W <= max_lanes (lane-dense fold)."""
    best = 1
    for tb in range(1, n_imgs + 1):
        if n_imgs % tb == 0 and tb * W <= max_lanes:
            best = tb
    return best


def bessel_conv2d(x, Ah, Aw, matmul_dtype=jnp.float32):
    """x: (B, C, H, W) float32 -> (B, C, S, H, W), S = 1 + Ah.shape[0].

    Scale 0 is the exact identity (the input itself); scales 1.. are the
    separable discrete-Gaussian blurs.
    """
    B, C, H, W = x.shape
    Sb = Ah.shape[0]
    if Sb == 0:
        return x[:, :, None]

    BC = B * C
    TB = _pick_batch_tile(BC, W)          # images folded per grid step
    NT = BC // TB                         # number of batch tiles
    TBW = TB * W

    # Fold TB images along the lane axis (wrapper-side layout plumbing):
    # column index = tb*W + w.
    x_cols = (x.reshape(NT, TB, H, W)
                .transpose(0, 2, 1, 3)
                .reshape(NT, H, TBW))

    # Block-diagonal horizontal-blur matrix shared across the TB images.
    eye_tb = jnp.eye(TB, dtype=Aw.dtype)
    AwB = jnp.einsum('pq,swv->spwqv', eye_tb, Aw).reshape(Sb, TBW, TBW)

    if matmul_dtype != jnp.float32:
        # Optional bf16 operands (f32 accumulation) for v6e/v7x MXU peak.
        x_cols = x_cols.astype(matmul_dtype)
        Ah = Ah.astype(matmul_dtype)
        AwB = AwB.astype(matmul_dtype)

    itemsize = 4
    flops = 2 * Sb * NT * (H * H * TBW + H * TBW * TBW)
    bytes_accessed = itemsize * Sb * (2 * NT * H * TBW + H * H + TBW * TBW)

    blurred = pl.pallas_call(
        bessel_blur_kernel,
        out_shape=jax.ShapeDtypeStruct((Sb, NT, H, TBW), x.dtype),
        grid=(Sb, NT),  # scales outer: band matrices stay VMEM-resident
        in_specs=[
            pl.BlockSpec((None, H, TBW), lambda s, bt: (bt, 0, 0)),
            pl.BlockSpec((None, H, H), lambda s, bt: (s, 0, 0)),
            pl.BlockSpec((None, TBW, TBW), lambda s, bt: (s, 0, 0)),
        ],
        out_specs=pl.BlockSpec((None, None, H, TBW),
                               lambda s, bt: (s, bt, 0, 0)),
        compiler_params=pltpu.CompilerParams(
            dimension_semantics=("parallel", "parallel"),
            vmem_limit_bytes=32 * 1024 * 1024),
        cost_estimate=pl.CostEstimate(flops=flops, transcendentals=0,
                                      bytes_accessed=bytes_accessed),
    )(x_cols, Ah, AwB)

    # Unfold lanes back to (B, C, Sb, H, W) and prepend the exact identity.
    blurred = (blurred.reshape(Sb, NT, H, TB, W)
                      .transpose(1, 3, 0, 2, 4)
                      .reshape(B, C, Sb, H, W))
    return jnp.concatenate([x[:, :, None], blurred], axis=2)


# -----------------------------------------------------------------------------
# Pure-JAX reference reproducing the PyTorch forward (F.conv2d, NCHW).
# -----------------------------------------------------------------------------
def reference_forward(x, kernels_1d, widths):
    outs = [x[:, :, None]]  # identity scale (input.unsqueeze(2))
    for k1d, w in zip(kernels_1d, widths):
        w = int(w)
        kx = jnp.asarray(k1d).reshape(1, 1, 1, 2 * w + 1)  # OIHW
        ky = jnp.asarray(k1d).reshape(1, 1, 2 * w + 1, 1)
        h = jax.lax.conv_general_dilated(
            x, kx, window_strides=(1, 1), padding=((0, 0), (w, w)),
            dimension_numbers=("NCHW", "OIHW", "NCHW"))
        v = jax.lax.conv_general_dilated(
            h, ky, window_strides=(1, 1), padding=((w, w), (0, 0)),
            dimension_numbers=("NCHW", "OIHW", "NCHW"))
        outs.append(v[:, :, None])
    return jnp.concatenate(outs, axis=2)


if __name__ == "__main__":
    # Module-consistent small shapes: the module's (1,1,1,K)/(1,1,K,1) conv
    # weights force channels == 1.
    B, C, H, W = 2, 1, 16, 16
    base, zero_scale, n_scales = 2.0, 0.5, 4

    scales, widths, kernels_1d, Ah, Aw = make_bessel_params(
        base, zero_scale, n_scales, H, W)

    key = jax.random.PRNGKey(0)
    x = jax.random.normal(key, (B, C, H, W), dtype=jnp.float32)

    out = jax.block_until_ready(bessel_conv2d(x, Ah, Aw))
    ref = jax.block_until_ready(reference_forward(x, kernels_1d, widths))

    assert out.shape == (B, C, n_scales, H, W), out.shape
    np.testing.assert_allclose(np.asarray(out), np.asarray(ref),
                               rtol=1e-5, atol=1e-5)
    print("KERNEL_OK")
</pallas_src>

<mosaic_0001>
module attributes {stable_mosaic.version = 11 : i64} {
  func.func @bessel_blur_kernel(%arg0: i32, %arg1: i32, %arg2: memref<1x16x32xf32, #tpu.memory_space<vmem>>, %arg3: memref<1x16x16xf32, #tpu.memory_space<vmem>>, %arg4: memref<1x32x32xf32, #tpu.memory_space<vmem>>, %arg5: memref<1x1x16x32xf32, #tpu.memory_space<vmem>>) attributes {dimension_semantics = [#tpu.dimension_semantics<parallel>, #tpu.dimension_semantics<parallel>], iteration_bounds = array<i64: 3, 1>, scalar_prefetch = 0 : i64, scratch_operands = 0 : i64, tpu.core_type = #tpu.core_type<tc>, window_params = [{transform_indices = @transform_0, window_bounds = array<i64: 1, 16, 32>}, {transform_indices = @transform_1, window_bounds = array<i64: 1, 16, 16>}, {transform_indices = @transform_2, window_bounds = array<i64: 1, 32, 32>}, {transform_indices = @transform_3, window_bounds = array<i64: 1, 1, 16, 32>}]} {
    %c0 = arith.constant 0 : index
    %c0_0 = arith.constant 0 : index
    %c0_1 = arith.constant 0 : index
    %0 = vector.load %arg3[%c0, %c0_0, %c0_1] : memref<1x16x16xf32, #tpu.memory_space<vmem>>, vector<1x16x16xf32>
    %1 = vector.shape_cast %0 : vector<1x16x16xf32> to vector<16x16xf32>
    %c0_2 = arith.constant 0 : index
    %c0_3 = arith.constant 0 : index
    %c0_4 = arith.constant 0 : index
    %2 = vector.load %arg2[%c0_2, %c0_3, %c0_4] : memref<1x16x32xf32, #tpu.memory_space<vmem>>, vector<1x16x32xf32>
    %3 = vector.shape_cast %2 : vector<1x16x32xf32> to vector<16x32xf32>
    %cst = arith.constant dense<0.000000e+00> : vector<16x32xf32>
    %4 = tpu.matmul %1, %3, %cst {dimension_numbers = #tpu.dot_dimension_numbers<[1], [0], [0], [1], [0, 0, 1, 1], [], []>} : vector<16x16xf32>, vector<16x32xf32>, vector<16x32xf32> -> vector<16x32xf32>
    %c0_5 = arith.constant 0 : index
    %c0_6 = arith.constant 0 : index
    %c0_7 = arith.constant 0 : index
    %5 = vector.load %arg4[%c0_5, %c0_6, %c0_7] : memref<1x32x32xf32, #tpu.memory_space<vmem>>, vector<1x32x32xf32>
    %6 = vector.shape_cast %5 : vector<1x32x32xf32> to vector<32x32xf32>
    %cst_8 = arith.constant dense<0.000000e+00> : vector<16x32xf32>
    %7 = tpu.matmul %4, %6, %cst_8 {dimension_numbers = #tpu.dot_dimension_numbers<[1], [0], [0], [1], [0, 0, 1, 1], [], []>} : vector<16x32xf32>, vector<32x32xf32>, vector<16x32xf32> -> vector<16x32xf32>
    %c0_9 = arith.constant 0 : index
    %c0_10 = arith.constant 0 : index
    %c0_11 = arith.constant 0 : index
    %c0_12 = arith.constant 0 : index
    %8 = vector.load %arg5[%c0_9, %c0_10, %c0_11, %c0_12] : memref<1x1x16x32xf32, #tpu.memory_space<vmem>>, vector<1x1x16x32xf32>
    %9 = vector.shape_cast %8 : vector<1x1x16x32xf32> to vector<16x32xf32>
    %10 = vector.shape_cast %7 : vector<16x32xf32> to vector<1x1x16x32xf32>
    tpu.vector_store %arg5[%c0_9, %c0_10, %c0_11, %c0_12], %10 {strides = array<i32>} : memref<1x1x16x32xf32, #tpu.memory_space<vmem>>, vector<1x1x16x32xf32>,
    return
  }
  func.func @transform_0(%arg0: i32, %arg1: i32) -> (i32, i32, i32) {
    %c0_i32 = arith.constant 0 : i32
    %c0_i32_0 = arith.constant 0 : i32
    %c0_i32_1 = arith.constant 0 : i32
    return %arg1, %c0_i32, %c0_i32_0 : i32, i32, i32
  }
  func.func @transform_1(%arg0: i32, %arg1: i32) -> (i32, i32, i32) {
    %c0_i32 = arith.constant 0 : i32
    %c0_i32_0 = arith.constant 0 : i32
    %c0_i32_1 = arith.constant 0 : i32
    return %arg0, %c0_i32, %c0_i32_0 : i32, i32, i32
  }
  func.func @transform_2(%arg0: i32, %arg1: i32) -> (i32, i32, i32) {
    %c0_i32 = arith.constant 0 : i32
    %c0_i32_0 = arith.constant 0 : i32
    %c0_i32_1 = arith.constant 0 : i32
    return %arg0, %c0_i32, %c0_i32_0 : i32, i32, i32
  }
  func.func @transform_3(%arg0: i32, %arg1: i32) -> (i32, i32, i32, i32) {
    %c0_i32 = arith.constant 0 : i32
    %c0_i32_0 = arith.constant 0 : i32
    %c0_i32_1 = arith.constant 0 : i32
    return %arg0, %arg1, %c0_i32, %c0_i32_0 : i32, i32, i32, i32
  }
}

</mosaic_0001>

<bundles_post_ra>
// kernel: tpu_custom_call.1
= control target key start
LH: loop header
LB: loop body
LE: loop exit
PB: predicated region body
PF: predicated region fallthrough
CT: control target
= control target key end

     0   :  { %8 = vsyncpa [#allocation3], 0  ;;  %s1112_s0 = inlined_call_operand.hbm [shape: f32[1,16,32], index: 0, kind: input, shape index: {}]   ;;  %s1113_s1 = inlined_call_operand.hbm [shape: f32[3,16,16], index: 1, kind: input, shape index: {}]   ;;  %s1114_s2 = inlined_call_operand.hbm [shape: f32[3,32,32], index: 2, kind: input, shape index: {}]   ;;  %s1115_s3 = inlined_call_operand.hbm [shape: f32[3,1,16,32], index: 3, kind: output, shape index: {}]  }
   0x1   :  { %9 = vsyncpa [#allocation6], 0 }
   0x2   :  { %11 = vsyncpa [#allocation6 + $0x1], 0 }
   0x3   :  { %12 = vsyncpa [#allocation4], 0 }
   0x4   :  { %14 = vsyncpa [#allocation4 + $0x1], 0  ;;  %s905_s12 = smov 0   ;;  %s907_s13 = smov 0  }
   0x5   :  { %s909_s14 = smov 0   ;;  %s911_s15 = smov 0  }
   0x6   :  { %s913_s16 = smov 0   ;;  %s915_s17 = smov 0  }
   0x7 LB: > { %s32_s18 = sadd.s32 1, %s871_s16  ;;  %s65_s19 = sadd.s32 1, %s863_s14  ;;  %s875_s17 = sphi %s915_s17, %s20_s17   ;;  %s871_s16 = sphi %s913_s16, %s1136_s16   ;;  %s867_s15 = sphi %s911_s15, %s1135_s15   ;;  %s863_s14 = sphi %s909_s14, %s1134_s14   ;;  %s859_s13 = sphi %s907_s13, %s1133_s13   ;;  %s855_s12 = sphi %s905_s12, %s1132_s12  }
   0x8   : > { %p34_p0 = scmp.ge.s32.totalorder %s32_s18, 3  ;;  %p72_p1 = scmp.ne.s32.totalorder %s863_s14, %s859_s13 }
   0x9   : > { %p73_p2 = scmp.eq.s32.totalorder %s875_s17, 0  ;;  %p653_p5 = scmp.lt.s32.totalorder %s875_s17, 3 }
   0xa   : > { %s1138_s18 = smov (%p34_p0, %s32_s18), 0  ;;  %s172_s22 = sand.u32 1, %s875_s17  }
   0xb   : > { %p945_p3 = por %p73_p2, %p72_p1  ;;  %s62_s21 = ssub.s32 %s871_s16, %s1138_s18 }
   0xc   : > { %p63_p4 = scmp.eq.s32.totalorder %s62_s21, 0  ;;  %s174_s23 = sand.u32 1, %s863_s14  }
   0xd   : > { %s576_s25 = sshll.u32 %s174_s23, 4  ;;  %s596_s26 = sshll.u32 %s871_s16, 8 }
   0xe   : > { %s955_s24 = scalar_select %p63_p4, %s863_s14, %s65_s19  }
   0xf   : > { %s182_s29 = scalar_lea.hbm %s1113_s1, %s596_s26  ;;  %s176_s30 = scalar_lea.vmem [#allocation5], %s576_s25 }
  0x10   : > { %s183_s4 = sshll.u32 %s176_s30, 4  ;;  %p963_p6 = pnand %p653_p5, %p945_p3  ;;  %s184_s4 = int_to_ptr.vmem [resolvable:$true] %s183_s4 }
  0x11   : > { %s579_s6 = sshll.u32 %s174_s23, 5  ;;  %s967_s7 = scalar_lea.sflag [#allocation6], %s172_s22 }
  0x12   : > { %p711_p7 = pneg %p963_p6  ;;  %s722_s8 = scalar_lea.vmem %s184_s4, 256 }
  0x13   : > { %p723_p8 = scmp.ne.s32.totalorder %s184_s4, %s722_s8  ;;  %s877_s9 = smov [#allocation5]  }
  0x14   : > { %s727_s10 = sshll.u32 %s877_s9, 4  ;;  %s728_s10 = int_to_ptr.vmem [resolvable:$false] %s727_s10 }
  0x15   : > { %p725_p9 = pnand %p723_p8, %p711_p7  ;;  %s729_s11 = scalar_lea.vmem %s728_s10, 512 }
  0x16   : > { %p730_p11 = scmp.lt.s32.totalorder %s184_s4, %s728_s10  ;;  %p731_p12 = scmp.lt.s32.totalorder %s729_s11, %s722_s8 }
  0x17   : > { %p726_p10 = pneg %p725_p9 }
  0x18   : > { %p732_p13 = por %p731_p12, %p730_p11 }
  0x1a   : > { %p733_p0 = pnand %p732_p13, %p726_p10 }
  0x1c   : > { %736 = shalt.err (!%p733_p0)
}
  0x1d   : > { %s1116_s19 = smov 128   ;;  %s879_s20 = smov 8  }
  0x1e   : > { %644 = dma.hbm_to_vmem [thread:$0]  (!%p963_p6), %s182_s29, 256, %s184_s4, %s967_s7, %s1116_s19, %s1116_s19, %s879_s20  }
  0x1f   : > { %s197_s21 = scalar_lea.vmem [#allocation7], %s579_s6  ;;  %s981_s23 = sadd.s32 4294967295, %s875_s17  }
  0x20   : > { %s204_s22 = sshll.u32 %s197_s21, 4  ;;  %s572_s25 = sadd.s32 4294967294, %s875_s17   ;;  %s205_s22 = int_to_ptr.vmem [resolvable:$true] %s204_s22 }
  0x21   : > { %p78_p2 = scmp.ne.s32.totalorder %s859_s13, %s855_s12  ;;  %p1118_p3 = scmp.eq.s32.totalorder %s981_s23, 0 }
  0x22   : > { %p130_p4 = scmp.eq.s32.totalorder %s981_s23, 2  ;;  %p136_p5 = scmp.eq.s32.totalorder %s572_s25, 2 }
  0x23   : > { %p990_p8 = por %p1118_p3, %p78_p2  ;;  %p573_p9 = scmp.ge.s32.totalorder %s875_s17, 1 }
  0x24   : > { %p998_p10 = por %p130_p4, %p72_p1  ;;  %p1002_p11 = por %p136_p5, %p78_p2 }
  0x25   : > { %p143_p12 = scmp.lt.s32.totalorder %s875_s17, 4  ;;  %s597_s29 = sshll.u32 %s871_s16, 9 }
  0x26   : > { %s1123_s27 = scalar_select %p998_p10, 1, 0 }
  0x27   : > { %s1124_s28 = scalar_select %p1002_p11, 1, 0 }
  0x28   : > { %p1008_p13 = pnand %p573_p9, %p143_p12  ;;  %s880_s4 = smov [#allocation2]  }
  0x29   : > { %s158_s6 = sshll.u32 %s880_s4, 4  ;;  %s203_s10 = scalar_lea.hbm %s1114_s2, %s597_s29  ;;  %s159_s6 = int_to_ptr.vmem [resolvable:$true] %s158_s6 }
  0x2a   : > { %p637_p1 = pneg %p1008_p13  ;;  %s750_s11 = scalar_lea.vmem %s205_s22, 512 }
  0x2b   : > { %p751_p0 = scmp.ne.s32.totalorder %s205_s22, %s750_s11  ;;  %s881_s21 = smov [#allocation7]  }
  0x2c   : > { %s755_s25 = sshll.u32 %s881_s21, 4  ;;  %s756_s25 = int_to_ptr.vmem [resolvable:$false] %s755_s25 }
  0x2d   : > { %p753_p2 = pnand %p751_p0, %p711_p7  ;;  %s757_s19 = scalar_lea.vmem %s756_s25, 1024 }
  0x2e   : > { %p758_p5 = scmp.lt.s32.totalorder %s205_s22, %s756_s25  ;;  %p759_p9 = scmp.lt.s32.totalorder %s757_s19, %s750_s11 }
  0x2f   : > { %p754_p4 = pneg %p753_p2 }
  0x30   : > { %p760_p12 = por %p759_p9, %p758_p5 }
  0x32   : > { %p761_p3 = pnand %p760_p12, %p754_p4 }
  0x34   : > { %764 = shalt.err (!%p761_p3)
}
  0x35   : > { %s1126_s29 = smov 128   ;;  %p1127_p7 = scmp.eq.s32.totalorder %s981_s23, 0 }
  0x36   : > { %647 = dma.hbm_to_vmem [thread:$0]  (!%p963_p6), %s203_s10, 512, %s205_s22, %s967_s7, %s1126_s29, %s1126_s29, %s879_s20  }
  0x37   : > { %p638_p0 = pnand %p637_p1, %p1127_p7  ;;  %s776_s4 = scalar_lea.vmem %s159_s6, 256 }
  0x38   : > { %p777_p11 = scmp.ne.s32.totalorder %s159_s6, %s776_s4  ;;  %p784_p3 = scmp.lt.s32.totalorder %s159_s6, %s159_s6 }
  0x39   : > { %p767_p2 = pneg %p638_p0  ;;  %p785_p9 = scmp.lt.s32.totalorder %s776_s4, %s776_s4 }
  0x3b   : > { %p779_p5 = pnand %p777_p11, %p767_p2  ;;  %p786_p12 = por %p785_p9, %p784_p3 }
  0x3d   : > { %p780_p4 = pneg %p779_p5 }
  0x3f   : > { %p787_p10 = pnand %p786_p12, %p780_p4 }
  0x41   : > { %790 = shalt.err (!%p787_p10)
}
  0x42   : > { %640 = dma.hbm_to_vmem [thread:$0]  (!%p638_p0), %s1112_s0, 256, %s159_s6, [#allocation3], %s1126_s29, %s1126_s29, %s879_s20  }
  0x43   : > { %216 = sbr.rel (%p1008_p13) target bundleno = 487 (0x1e7), region = 32  ;;  %p1128_p6 = scmp.eq.s32.totalorder (!%p1008_p13), %s981_s23, 0 }
  0x48   : > { %842 = dma.done.wait (%p1128_p6), [#allocation3], 256   ;;  %p1129_p11 = pmov %p1128_p6 }
  0x49   : > { %s222_s19 = sand.u32 1, %s981_s23   ;;  %s1045_s22 = sand.u32 1, %s859_s13  }
  0x4a   : > { %844 = vsyncadd (%p1129_p11), [#allocation3], 4294967040  ;;  %s584_s8 = sshll.u32 %s1045_s22, 4  ;;  %s223_s9 = scalar_lea.sflag [#allocation6], %s222_s19 }
  0x4b   : > { %s226_s20 = scalar_lea.vmem [#allocation5], %s584_s8 }
  0x4c   : > { %846 = dma.done.wait (%p990_p8), %s223_s9, 768  }
  0x4d   : > { %848 = vsyncadd (%p990_p8), %s223_s9, 4294966528  ;;  %s585_s30 = sshll.u32 %s1045_s22, 5  ;;  %vm267_vm0 = vcmask 130048   ;;  %v266_v0 = vld [vmem:[#allocation2 + $0x8] sm:$0xff]  ;;  %v265_v1 = vld [vmem:[#allocation2] sm:$0xff]  ;;  %vm353_vm1 = vcmask 261120  }
  0x4e   : > { %v263_v2 = vld [vmem:[%s226_s20] sm:$0xff]  ;;  %609 = vmatprep.subr.mxu0 %v266_v0  ;;  %s235_s23 = scalar_lea.vmem [#allocation7], %s585_s30  ;;  %v264_v5 = vld [vmem:[%s226_s20 + $0x8] sm:$0xff]  ;;  %s262_s26 = scalar_lea.vmem [#allocation8], %s584_s8 }
  0x4f   : > { %613 = vmatprep.mubr.msk.f32.mxu0 %vm267_vm0, %v263_v2  ;;  %v352_v3 = vld [vmem:[%s235_s23 + $0x18] sm:$0xff]  ;;  %v351_v4 = vld [vmem:[%s235_s23 + $0x10] sm:$0xff]  ;;  %610 = vmatpush3.msra.mxu0 %v266_v0  ;;  %v350_v6 = vld [vmem:[%s235_s23 + $0x8] sm:$0xff]  ;;  %s453_s6 = sshll.u32 %s262_s26, 4  ;;  %s598_s10 = sshll.u32 %s867_s15, 8  ;;  %s1060_s6 = int_to_ptr.vmem [resolvable:$true] %s453_s6 }
  0x50   : > { %616 = vmatprep.subr.mxu1 %v352_v3  ;;  %611 = vmatprep.subr.mxu0 %v265_v1  ;;  %v349_v7 = vld [vmem:[%s235_s23] sm:$0xff]  ;;  %s1065_s25 = scalar_lea.hbm %s1115_s3, %s598_s10  ;;  %s438_s29 = scalar_lea.sflag [#allocation4], %s1045_s22 }
  0x51   : > { %617 = vmatpush3.msra.mxu1 %v352_v3  ;;  %612 = vmatpush3.msra.mxu0 %v265_v1  ;;  %s791_s4 = scalar_lea.vmem %s1060_s6, 256  ;;  %p1130_p10 = scmp.ne.s32.totalorder %s1123_s27, 0 }
  0x52   : > { %618 = vmatprep.subr.mxu1 %v351_v4  ;;  %614 = vmatmul.mubr.msk.f32.vlgmr.msra.gmra.mxu0 %vm267_vm0, %v264_v5  ;;  %p792_p8 = scmp.ne.s32.totalorder %s1060_s6, %s791_s4  ;;  %s882_s15 = smov [#allocation8]  }
  0x53   : > { %619 = vmatpush3.msra.mxu1 %v351_v4  ;;  %s795_s5 = sshll.u32 %s882_s15, 4  ;;  %s796_s5 = int_to_ptr.vmem [resolvable:$false] %s795_s5 }
  0x54   : > { %620 = vmatprep.subr.mxu1 %v350_v6  ;;  %p793_p13 = pnand %p792_p8, %p1130_p10  ;;  %s797_s7 = scalar_lea.vmem %s796_s5, 512 }
  0x55   : > { %621 = vmatpush3.msra.mxu1 %v350_v6  ;;  %p798_p7 = scmp.lt.s32.totalorder %s1060_s6, %s796_s5  ;;  %p799_p0 = scmp.lt.s32.totalorder %s797_s7, %s791_s4 }
  0x56   : > { %622 = vmatprep.subr.mxu1 %v349_v7  ;;  %p794_p1 = pneg %p793_p13 }
  0x57   : > { %623 = vmatpush3.msra.mxu1 %v349_v7  ;;  %p800_p2 = por %p799_p0, %p798_p7 }
  0x59   : > { %p801_p5 = pnand %p800_p2, %p794_p1 }
 0x112   : > { %v615_v8 = vpop.f32.mrf.mxu0 }
 0x114   : > { %v340_v9 = vpop.f32.mrf.mxu0 }
 0x115   : > { %624 = vmatprep.mubr.msk.f32.mxu1 %vm353_vm1, %v340_v9 }
 0x116   : > { %625 = vmatmul.mubr.msk.f32.vlgmr.msra.gmra.mxu1 %vm353_vm1, %v615_v8 }
 0x1d6   : > { %v626_v10 = vpop.f32.mrf.mxu1 }
 0x1d7   : > { %436 = vst.msk [vmem:[%s262_s26 + $0x8] sm:$0xff] %vm353_vm1, %v626_v10 }
 0x1d8   : > { %v426_v11 = vpop.f32.mrf.mxu1 }
 0x1d9   : > { %435 = vst.msk [vmem:[%s262_s26] sm:$0xff] %vm353_vm1, %v426_v11 }
 0x1da   : > { %804 = shalt.err (!%p801_p5)
}
 0x1db   : > { %s805_s19 = scalar_lea.hbm %s1065_s25, 256  ;;  %s809_s20 = scalar_lea.hbm %s1115_s3, 768 }
 0x1dc   : > { %p806_p4 = scmp.ne.s32.totalorder %s1065_s25, %s805_s19  ;;  %p810_p12 = scmp.lt.s32.totalorder %s1065_s25, %s1115_s3 }
 0x1dd   : > { %p811_p6 = scmp.lt.s32.totalorder %s809_s20, %s805_s19 }
 0x1de   : > { %p807_p3 = pnand %p806_p4, %p1130_p10 }
 0x1df   : > { %p812_p11 = por %p811_p6, %p810_p12 }
 0x1e0   : > { %p808_p9 = pneg %p807_p3 }
 0x1e2   : > { %p813_p8 = pnand %p812_p11, %p808_p9 }
 0x1e4   : > { %816 = shalt.err (!%p813_p8)
}
 0x1e5   : > { %s883_s26 = smov 128   ;;  %s884_s10 = smov 8  }
 0x1e6   : > { %635 = dma.vmem_to_hbm [thread:$0]  (%p1130_p10), %s1060_s6, 256, %s1065_s25, %s438_s29, %s883_s26, %s883_s26, %s884_s10  }
 0x1e7 PF: > { %p655_p13 = scmp.ge.s32.totalorder %s875_s17, 2  ;;  %s468_s11 = sand.u32 1, %s855_s12  }
 0x1e8   : > { %p1131_p1 = scmp.ne.s32.totalorder %s1124_s28, 0  ;;  %s469_s21 = scalar_lea.sflag [#allocation4], %s468_s11 }
 0x1ea   : > { %p649_p7 = pnand %p655_p13, %p1131_p1 }
 0x1ec   : > { %p650_p0 = pneg %p649_p7 }
 0x1ee   : > { %850 = dma.done.wait (%p650_p0), %s469_s21, 256  }
 0x1ef   : > { %852 = vsyncadd (%p650_p0), %s469_s21, 4294967040  ;;  %s20_s17 = sadd.s32 1, %s875_s17   ;;  %s1132_s12 = smov %s859_s13 }
 0x1f0   : > { %p17_p2 = scmp.ge.s32.totalorder %s20_s17, 5   ;;  %s1133_s13 = smov %s863_s14 }
 0x1f1   : > { %s1134_s14 = smov %s955_s24  ;;  %s1135_s15 = smov %s871_s16 }
 0x1f2   : > { %s1136_s16 = smov %s1138_s18  ;;  %19 = sbr.rel (!%p17_p2) target bundleno = 7 (0x7), region = 94 }
 0x1f7   :  { %474 = vsyncpa [#allocation3], 1 }
 0x1f8   :  { %476 = vsyncpa [#allocation3 + $0x1], 1 }
 0x1f9   :  { %477 = vsyncpa [#allocation6], 1 }
 0x1fa   :  { %479 = vsyncpa [#allocation6 + $0x1], 1 }
 0x1fb   :  { %480 = vsyncpa [#allocation4], 1 }
 0x1fc   :  { %482 = vsyncpa [#allocation4 + $0x1], 1 }

</bundles_post_ra>
